<compile_context>
chip_gen: v5e
topology: v5e:2x2
jax: 0.10.0
libtpu: 0.0.40
codegen_flags: <defaults>
</compile_context>

<pallas_src>
import functools

import jax
import jax.numpy as jnp
from jax.experimental import pallas as pl
from jax.experimental.pallas import tpu as pltpu


# ---------------------------------------------------------------------------
# Chip detection (host-side, best effort; safe fallbacks)
# ---------------------------------------------------------------------------
def _chip_flags():
    try:
        kind = jax.devices()[0].device_kind.lower()
    except Exception:
        kind = ""
    is_v7 = ("v7" in kind) or ("7x" in kind)
    has_bf16_vpu = is_v7 or ("v6" in kind)
    return is_v7, has_bf16_vpu


_IS_V7X, _HAS_BF16_VPU = _chip_flags()


def _round_up(x, m):
    return ((x + m - 1) // m) * m


# ---------------------------------------------------------------------------
# Shared epilogue (used by both kernels AND the reference -> identical math)
# ---------------------------------------------------------------------------
def _relu6_to_bf16(acc_f32, bias_f32, bf16_epilogue):
    """relu6(acc + bias) -> bf16.  bias_f32 may be None (already folded)."""
    if bf16_epilogue:
        y = acc_f32.astype(jnp.bfloat16)
        if bias_f32 is not None:
            y = y + bias_f32.astype(jnp.bfloat16)
        return jnp.clip(y, 0.0, 6.0)
    else:
        y = acc_f32 if bias_f32 is None else acc_f32 + bias_f32
        return jnp.clip(y, 0.0, 6.0).astype(jnp.bfloat16)


# ---------------------------------------------------------------------------
# Kernel A: small batch, grid over layers (weight DMA hidden behind compute)
# ---------------------------------------------------------------------------
def _gen_layer_kernel(x_ref, w1_ref, wk_ref, bk_ref, o_ref, act_ref,
                      *, bf16_epilogue):
    """Grid axis k = 0..4 walks fc2..fc5, fc7.  fc1 runs in a k==0 prologue.

    x_ref:   (B_pad, F_pad) bf16  (ones column carries the fc1 bias)
    w1_ref:  (F_pad, H)     bf16  fc1 weight, BN + bias folded
    wk_ref:  (1, H, H)      bf16  weight of layer k+1 (fc2..fc5, fc7)
    bk_ref:  (1, 1, H)      f32   bias of layer k+1
    o_ref:   (B_pad, H)     f32   final output (written at the last step)
    act_ref: (B_pad, H)     bf16  activation carried across grid steps
    """
    k = pl.program_id(0)
    last = pl.num_programs(0) - 1

    @pl.when(k == 0)
    def _():
        # fc1 + bn1 (folded) + relu6; dropout = identity in eval mode.
        y = jnp.dot(x_ref[...], w1_ref[...], preferred_element_type=jnp.float32)
        act_ref[...] = _relu6_to_bf16(y, None, bf16_epilogue)

    y = jnp.dot(act_ref[...], wk_ref[0], preferred_element_type=jnp.float32)
    b = bk_ref[0]  # (1, H) f32

    @pl.when(k < last)
    def _():
        act_ref[...] = _relu6_to_bf16(y, b, bf16_epilogue)

    @pl.when(k == last)
    def _():
        # fc7: no BN, no activation.
        o_ref[...] = (y + b).astype(o_ref.dtype)


# ---------------------------------------------------------------------------
# Kernel B: large batch, grid over batch tiles (weights VMEM-resident)
# ---------------------------------------------------------------------------
def _gen_batch_kernel(x_ref, w1_ref, wstack_ref, bstack_ref, o_ref,
                      *, bf16_epilogue):
    """One batch tile through all 6 (BN-folded) layers.

    x_ref:      (TB, F_pad)  bf16
    w1_ref:     (F_pad, H)   bf16
    wstack_ref: (5, H, H)    bf16  fc2..fc5, fc7
    bstack_ref: (5, 1, H)    f32
    o_ref:      (TB, H)      f32
    """
    y = jnp.dot(x_ref[...], w1_ref[...], preferred_element_type=jnp.float32)
    h = _relu6_to_bf16(y, None, bf16_epilogue)          # fc1 bias folded in w1

    for k in range(4):                                   # fc2..fc5
        y = jnp.dot(h, wstack_ref[k], preferred_element_type=jnp.float32)
        h = _relu6_to_bf16(y, bstack_ref[k], bf16_epilogue)

    y = jnp.dot(h, wstack_ref[4], preferred_element_type=jnp.float32)
    o_ref[...] = (y + bstack_ref[4]).astype(o_ref.dtype)


# ---------------------------------------------------------------------------
# Host-side glue
# ---------------------------------------------------------------------------
def fold_bn_into_linear(w, b, gamma, beta, mean, var, eps=1e-5):
    """Fold eval-mode BatchNorm1d into the preceding Linear (w is (in,out))."""
    scale = gamma / jnp.sqrt(var + eps)
    return w * scale[None, :], (b - mean) * scale + beta


@jax.jit
def generator_forward(x, w1, wstack, bstack):
    """x: (B, F) f32.  w1: (F_pad, H) bf16 (bias folded into row F).
    wstack: (5, H, H) bf16.  bstack: (5, 1, H) f32.  Returns (B, H) f32."""
    B, F = x.shape
    F_pad, H = w1.shape

    # Cast activations to bf16 and pad feature dim: [x | 1 | 0...0].
    pad_cols = F_pad - F
    xp = jnp.concatenate(
        [x.astype(jnp.bfloat16),
         jnp.ones((B, 1), jnp.bfloat16),
         jnp.zeros((B, pad_cols - 1), jnp.bfloat16)], axis=1)

    # Pad batch to a multiple of 8 (sublane alignment).
    B_pad = _round_up(B, 8)
    if B_pad != B:
        xp = jnp.pad(xp, ((0, B_pad - B), (0, 0)))

    bf16_ep = _HAS_BF16_VPU

    if B_pad <= 128:
        # --- Path A: layer-gridded (serving / small batch) -----------------
        out = pl.pallas_call(
            functools.partial(_gen_layer_kernel, bf16_epilogue=bf16_ep),
            out_shape=jax.ShapeDtypeStruct((B_pad, H), jnp.float32),
            grid_spec=pltpu.PrefetchScalarGridSpec(
                num_scalar_prefetch=0,
                grid=(5,),
                in_specs=[
                    pl.BlockSpec((B_pad, F_pad), lambda k: (0, 0)),   # x
                    pl.BlockSpec((F_pad, H), lambda k: (0, 0)),       # w1
                    pl.BlockSpec((1, H, H), lambda k: (k, 0, 0)),     # layer w
                    pl.BlockSpec((1, 1, H), lambda k: (k, 0, 0)),     # layer b
                ],
                out_specs=pl.BlockSpec((B_pad, H), lambda k: (0, 0)),
                scratch_shapes=[pltpu.VMEM((B_pad, H), jnp.bfloat16)],
            ),
            compiler_params=pltpu.CompilerParams(
                dimension_semantics=("arbitrary",),
                vmem_limit_bytes=8 << 20,
            ),
        )(xp, w1, wstack, bstack)
    else:
        # --- Path B: batch-gridded, weights VMEM-resident -------------------
        TB = 512
        if _IS_V7X and B_pad >= 16:
            # Ensure >= 2 grid steps so both v7x TensorCores get work.
            TB = min(TB, _round_up(pl.cdiv(B_pad, 2), 8))
        TB = min(TB, B_pad)
        B_pad2 = pl.cdiv(B_pad, TB) * TB
        if B_pad2 != B_pad:
            xp = jnp.pad(xp, ((0, B_pad2 - B_pad), (0, 0)))
            B_pad = B_pad2

        out = pl.pallas_call(
            functools.partial(_gen_batch_kernel, bf16_epilogue=bf16_ep),
            out_shape=jax.ShapeDtypeStruct((B_pad, H), jnp.float32),
            grid_spec=pltpu.PrefetchScalarGridSpec(
                num_scalar_prefetch=0,
                grid=(B_pad // TB,),
                in_specs=[
                    pl.BlockSpec((TB, F_pad), lambda i: (i, 0)),      # x tile
                    pl.BlockSpec((F_pad, H), lambda i: (0, 0)),       # w1
                    pl.BlockSpec((5, H, H), lambda i: (0, 0, 0)),     # weights
                    pl.BlockSpec((5, 1, H), lambda i: (0, 0, 0)),     # biases
                ],
                out_specs=pl.BlockSpec((TB, H), lambda i: (i, 0)),
            ),
            compiler_params=pltpu.CompilerParams(
                dimension_semantics=("parallel",),
                vmem_limit_bytes=16 << 20,
            ),
        )(xp, w1, wstack, bstack)

    return out[:B]


def init_params(key, input_size, hidden_size):
    """Deterministic synthetic parameters matching the module's shapes,
    BN-folded, feature-padded, bias-folded, bf16-packed into slabs."""
    ks = jax.random.split(key, 64)
    ki = iter(ks)

    def linear(in_f, out_f):
        w = jax.random.normal(next(ki), (in_f, out_f), jnp.float32) * 0.05
        b = jax.random.normal(next(ki), (out_f,), jnp.float32) * 0.05
        return w, b

    def bn(feat):
        gamma = 1.0 + 0.1 * jax.random.normal(next(ki), (feat,), jnp.float32)
        beta = 0.1 * jax.random.normal(next(ki), (feat,), jnp.float32)
        mean = 0.1 * jax.random.normal(next(ki), (feat,), jnp.float32)
        var = jnp.abs(1.0 + 0.1 * jax.random.normal(next(ki), (feat,), jnp.float32))
        return gamma, beta, mean, var

    folded_w, folded_b = [], []
    dims = [(input_size, hidden_size)] + [(hidden_size, hidden_size)] * 4
    for in_f, out_f in dims:                       # fc1..fc5 (+ BN)
        w, b = linear(in_f, out_f)
        g, bt, m, v = bn(out_f)
        wf, bf = fold_bn_into_linear(w, b, g, bt, m, v)
        folded_w.append(wf)
        folded_b.append(bf)
    w7, b7 = linear(hidden_size, hidden_size)      # fc7 (no BN)
    folded_w.append(w7)
    folded_b.append(b7)

    # fc1: lane-align K and fold the (BN-folded) bias into the extra row that
    # pairs with the "ones" input column.
    f_pad = pl.cdiv(input_size + 1, 128) * 128
    w1 = jnp.zeros((f_pad, hidden_size), jnp.float32)
    w1 = w1.at[:input_size].set(folded_w[0])
    w1 = w1.at[input_size].set(folded_b[0])
    w1 = w1.astype(jnp.bfloat16)                                   # (F_pad, H)

    wstack = jnp.stack(folded_w[1:], axis=0).astype(jnp.bfloat16)  # (5, H, H)
    bstack = jnp.stack(folded_b[1:], axis=0).astype(jnp.float32)[:, None, :]
    return w1, wstack, bstack                                      # b: (5,1,H)


def reference_forward(x, w1, wstack, bstack, bf16_epilogue):
    """Plain-jnp reference with identical numerics to the kernel."""
    B, F = x.shape
    F_pad, H = w1.shape
    xp = jnp.concatenate(
        [x.astype(jnp.bfloat16),
         jnp.ones((B, 1), jnp.bfloat16),
         jnp.zeros((B, F_pad - F - 1), jnp.bfloat16)], axis=1)
    y = jnp.dot(xp, w1, preferred_element_type=jnp.float32)
    h = _relu6_to_bf16(y, None, bf16_epilogue)
    for k in range(4):
        y = jnp.dot(h, wstack[k], preferred_element_type=jnp.float32)
        h = _relu6_to_bf16(y, bstack[k], bf16_epilogue)
    y = jnp.dot(h, wstack[4], preferred_element_type=jnp.float32)
    return y + bstack[4]


if __name__ == "__main__":
    INPUT_SIZE = 368          # module rule: input_size == 368 -> hidden 256
    HIDDEN_SIZE = 256

    key = jax.random.PRNGKey(0)
    kx_small, kx_big, kp = jax.random.split(key, 3)
    w1, wstack, bstack = init_params(kp, INPUT_SIZE, HIDDEN_SIZE)

    # Small serving batch (batch=8) -> layer-gridded path.
    x_small = jax.random.normal(kx_small, (8, INPUT_SIZE), jnp.float32)
    out_small = jax.block_until_ready(generator_forward(x_small, w1, wstack, bstack))
    ref_small = reference_forward(x_small, w1, wstack, bstack, _HAS_BF16_VPU)
    assert out_small.shape == (8, HIDDEN_SIZE)
    assert jnp.allclose(out_small, ref_small, atol=5e-2, rtol=5e-2), \
        "small-batch mismatch vs reference"

    # Larger batch -> batch-gridded path (weights VMEM-resident).
    x_big = jax.random.normal(kx_big, (200, INPUT_SIZE), jnp.float32)
    out_big = jax.block_until_ready(generator_forward(x_big, w1, wstack, bstack))
    ref_big = reference_forward(x_big, w1, wstack, bstack, _HAS_BF16_VPU)
    assert out_big.shape == (200, HIDDEN_SIZE)
    assert jnp.allclose(out_big, ref_big, atol=5e-2, rtol=5e-2), \
        "large-batch mismatch vs reference"

    # TODO(synk): Dropout2d(p=0.2) is treated as identity (eval mode); no
    # training-mode RNG dropout is implemented in the kernel.
    print("KERNEL_OK")
</pallas_src>

<mosaic_0001>
module attributes {stable_mosaic.version = 11 : i64} {
  func.func @_gen_layer_kernel(%arg0: i32, %arg1: memref<8x384xbf16, #tpu.memory_space<vmem>>, %arg2: memref<384x256xbf16, #tpu.memory_space<vmem>>, %arg3: memref<1x256x256xbf16, #tpu.memory_space<vmem>>, %arg4: memref<1x1x256xf32, #tpu.memory_space<vmem>>, %arg5: memref<8x256xf32, #tpu.memory_space<vmem>>, %arg6: memref<8x256xbf16, #tpu.memory_space<vmem>>) attributes {dimension_semantics = [#tpu.dimension_semantics<arbitrary>], iteration_bounds = array<i64: 5>, scalar_prefetch = 0 : i64, scratch_operands = 1 : i64, tpu.core_type = #tpu.core_type<tc>, window_params = [{pipeline_mode = #tpu.pipeline_mode<synchronous>, transform_indices = @transform_0, window_bounds = array<i64: 8, 384>}, {pipeline_mode = #tpu.pipeline_mode<synchronous>, transform_indices = @transform_1, window_bounds = array<i64: 384, 256>}, {transform_indices = @transform_2, window_bounds = array<i64: 1, 256, 256>}, {transform_indices = @transform_3, window_bounds = array<i64: 1, 1, 256>}, {pipeline_mode = #tpu.pipeline_mode<synchronous>, transform_indices = @transform_4, window_bounds = array<i64: 8, 256>}]} {
    %c0_i32 = arith.constant 0 : i32
    %0 = arith.cmpi eq, %arg0, %c0_i32 : i32
    %1 = arith.extui %0 : i1 to i32
    %c0_i32_0 = arith.constant 0 : i32
    %2 = arith.cmpi ne, %1, %c0_i32_0 : i32
    scf.if %2 {
      %c0_11 = arith.constant 0 : index
      %c0_12 = arith.constant 0 : index
      %15 = vector.load %arg1[%c0_11, %c0_12] : memref<8x384xbf16, #tpu.memory_space<vmem>>, vector<8x384xbf16>
      %c0_13 = arith.constant 0 : index
      %c0_14 = arith.constant 0 : index
      %16 = vector.load %arg2[%c0_13, %c0_14] : memref<384x256xbf16, #tpu.memory_space<vmem>>, vector<384x256xbf16>
      %cst_15 = arith.constant dense<0.000000e+00> : vector<8x256xf32>
      %17 = tpu.matmul %15, %16, %cst_15 {dimension_numbers = #tpu.dot_dimension_numbers<[1], [0], [0], [1], [0, 0, 1, 1], [], []>} : vector<8x384xbf16>, vector<384x256xbf16>, vector<8x256xf32> -> vector<8x256xf32>
      %cst_16 = arith.constant 0.000000e+00 : f32
      %cst_17 = arith.constant 6.000000e+00 : f32
      %18 = vector.broadcast %cst_16 : f32 to vector<8x256xf32>
      %19 = arith.maximumf %18, %17 : vector<8x256xf32>
      %20 = vector.broadcast %cst_17 : f32 to vector<8x256xf32>
      %21 = arith.minimumf %20, %19 : vector<8x256xf32>
      %22 = arith.truncf %21 : vector<8x256xf32> to vector<8x256xbf16>
      %c0_18 = arith.constant 0 : index
      %c0_19 = arith.constant 0 : index
      %23 = vector.load %arg6[%c0_18, %c0_19] : memref<8x256xbf16, #tpu.memory_space<vmem>>, vector<8x256xbf16>
      tpu.vector_store %arg6[%c0_18, %c0_19], %22 {strides = array<i32>} : memref<8x256xbf16, #tpu.memory_space<vmem>>, vector<8x256xbf16>,
    } else {
    }
    %c0 = arith.constant 0 : index
    %c0_1 = arith.constant 0 : index
    %3 = vector.load %arg6[%c0, %c0_1] : memref<8x256xbf16, #tpu.memory_space<vmem>>, vector<8x256xbf16>
    %c0_2 = arith.constant 0 : index
    %c0_3 = arith.constant 0 : index
    %c0_4 = arith.constant 0 : index
    %4 = vector.load %arg3[%c0_2, %c0_3, %c0_4] : memref<1x256x256xbf16, #tpu.memory_space<vmem>>, vector<1x256x256xbf16>
    %5 = vector.shape_cast %4 : vector<1x256x256xbf16> to vector<256x256xbf16>
    %cst = arith.constant dense<0.000000e+00> : vector<8x256xf32>
    %6 = tpu.matmul %3, %5, %cst {dimension_numbers = #tpu.dot_dimension_numbers<[1], [0], [0], [1], [0, 0, 1, 1], [], []>} : vector<8x256xbf16>, vector<256x256xbf16>, vector<8x256xf32> -> vector<8x256xf32>
    %c0_5 = arith.constant 0 : index
    %c0_6 = arith.constant 0 : index
    %c0_7 = arith.constant 0 : index
    %7 = vector.load %arg4[%c0_5, %c0_6, %c0_7] : memref<1x1x256xf32, #tpu.memory_space<vmem>>, vector<1x1x256xf32>
    %8 = vector.shape_cast %7 : vector<1x1x256xf32> to vector<1x256xf32>
    %c4_i32 = arith.constant 4 : i32
    %9 = arith.cmpi slt, %arg0, %c4_i32 : i32
    %10 = arith.extui %9 : i1 to i32
    %c0_i32_8 = arith.constant 0 : i32
    %11 = arith.cmpi ne, %10, %c0_i32_8 : i32
    scf.if %11 {
      %15 = vector.broadcast %8 : vector<1x256xf32> to vector<8x256xf32>
      %16 = arith.addf %6, %15 : vector<8x256xf32>
      %cst_11 = arith.constant 0.000000e+00 : f32
      %cst_12 = arith.constant 6.000000e+00 : f32
      %17 = vector.broadcast %cst_11 : f32 to vector<8x256xf32>
      %18 = arith.maximumf %17, %16 : vector<8x256xf32>
      %19 = vector.broadcast %cst_12 : f32 to vector<8x256xf32>
      %20 = arith.minimumf %19, %18 : vector<8x256xf32>
      %21 = arith.truncf %20 : vector<8x256xf32> to vector<8x256xbf16>
      %c0_13 = arith.constant 0 : index
      %c0_14 = arith.constant 0 : index
      %22 = vector.load %arg6[%c0_13, %c0_14] : memref<8x256xbf16, #tpu.memory_space<vmem>>, vector<8x256xbf16>
      tpu.vector_store %arg6[%c0_13, %c0_14], %21 {strides = array<i32>} : memref<8x256xbf16, #tpu.memory_space<vmem>>, vector<8x256xbf16>,
    } else {
    }
    %c4_i32_9 = arith.constant 4 : i32
    %12 = arith.cmpi eq, %arg0, %c4_i32_9 : i32
    %13 = arith.extui %12 : i1 to i32
    %c0_i32_10 = arith.constant 0 : i32
    %14 = arith.cmpi ne, %13, %c0_i32_10 : i32
    scf.if %14 {
      %15 = vector.broadcast %8 : vector<1x256xf32> to vector<8x256xf32>
      %16 = arith.addf %6, %15 : vector<8x256xf32>
      %c0_11 = arith.constant 0 : index
      %c0_12 = arith.constant 0 : index
      %17 = vector.load %arg5[%c0_11, %c0_12] : memref<8x256xf32, #tpu.memory_space<vmem>>, vector<8x256xf32>
      tpu.vector_store %arg5[%c0_11, %c0_12], %16 {strides = array<i32>} : memref<8x256xf32, #tpu.memory_space<vmem>>, vector<8x256xf32>,
    } else {
    }
    return
  }
  func.func @transform_0(%arg0: i32) -> (i32, i32) {
    %c0_i32 = arith.constant 0 : i32
    %c0_i32_0 = arith.constant 0 : i32
    %c0_i32_1 = arith.constant 0 : i32
    return %c0_i32, %c0_i32_0 : i32, i32
  }
  func.func @transform_1(%arg0: i32) -> (i32, i32) {
    %c0_i32 = arith.constant 0 : i32
    %c0_i32_0 = arith.constant 0 : i32
    %c0_i32_1 = arith.constant 0 : i32
    return %c0_i32, %c0_i32_0 : i32, i32
  }
  func.func @transform_2(%arg0: i32) -> (i32, i32, i32) {
    %c0_i32 = arith.constant 0 : i32
    %c0_i32_0 = arith.constant 0 : i32
    %c0_i32_1 = arith.constant 0 : i32
    return %arg0, %c0_i32, %c0_i32_0 : i32, i32, i32
  }
  func.func @transform_3(%arg0: i32) -> (i32, i32, i32) {
    %c0_i32 = arith.constant 0 : i32
    %c0_i32_0 = arith.constant 0 : i32
    %c0_i32_1 = arith.constant 0 : i32
    return %arg0, %c0_i32, %c0_i32_0 : i32, i32, i32
  }
  func.func @transform_4(%arg0: i32) -> (i32, i32) {
    %c0_i32 = arith.constant 0 : i32
    %c0_i32_0 = arith.constant 0 : i32
    %c0_i32_1 = arith.constant 0 : i32
    return %c0_i32, %c0_i32_0 : i32, i32
  }
}

</mosaic_0001>

<bundles_post_ra>
// kernel: generator_forward.1
= control target key start
LH: loop header
LB: loop body
LE: loop exit
PB: predicated region body
PF: predicated region fallthrough
CT: control target
= control target key end

     0   :  { %9 = vsyncpa [#allocation4], 0  ;;  %s1831_s0 = inlined_call_operand.vmem [shape: bf16[8,384], index: 0, kind: input, shape index: {}]   ;;  %s1832_s1 = inlined_call_operand.hbm [shape: bf16[384,256], index: 1, kind: input, shape index: {}]   ;;  %s1833_s2 = inlined_call_operand.hbm [shape: bf16[5,256,256], index: 2, kind: input, shape index: {}]   ;;  %s1834_s3 = inlined_call_operand.vmem [shape: f32[5,1,256], index: 3, kind: input, shape index: {}]   ;;  %s1835_s4 = inlined_call_operand.hbm [shape: f32[8,256], index: 4, kind: output, shape index: {}]  }
   0x1   :  { %10 = vsyncpa [#allocation7], 0 }
   0x2   :  { %12 = vsyncpa [#allocation7 + $0x1], 0 }
   0x3   :  { %13 = vsyncpa [#allocation5], 0  ;;  %s1634_s15 = smov 0   ;;  %s1636_s16 = smov 0  }
   0x4   :  { %s1638_s17 = smov 0   ;;  %s1640_s18 = smov 0  }
   0x5 LB: > { %s1653_s19 = sadd.s32 4294967295, %s1603_s18   ;;  %p81_p0 = scmp.ne.s32.totalorder %s1595_s16, %s1591_s15  ;;  %s1603_s18 = sphi %s1640_s18, %s1842_s18   ;;  %s1599_s17 = sphi %s1638_s17, %s1841_s17   ;;  %s1595_s16 = sphi %s1636_s16, %s1840_s16   ;;  %s1591_s15 = sphi %s1634_s15, %s1839_s15  }
   0x6   : > { %p82_p1 = scmp.eq.s32.totalorder %s1653_s19, 0  ;;  %p996_p2 = scmp.ge.s32.totalorder %s1603_s18, 1 }
   0x7   : > { %p139_p3 = scmp.lt.s32.totalorder %s1603_s18, 6  ;;  %p997_p4 = scmp.ne.s32.totalorder %s1653_s19, 0 }
   0x8   : > { %p1662_p5 = por %p82_p1, %p81_p0  ;;  %s153_s23 = sshll.u32 %s1832_s1, 4  ;;  %s154_s23 = int_to_ptr.hbm [resolvable:$true] %s153_s23 }
   0x9   : > { %p1669_p6 = pnand %p996_p2, %p139_p3  ;;  %s1605_s25 = smov [#allocation3]  }
   0xa   : > { %s155_s26 = sshll.u32 %s1605_s25, 4  ;;  %s1678_s27 = sadd.s32 1, %s1603_s18   ;;  %s156_s26 = int_to_ptr.vmem [resolvable:$true] %s155_s26 }
   0xb   : > { %p1424_p7 = pneg %p1669_p6  ;;  %s1606_s28 = smov 128  }
   0xc   : > { %s1607_s29 = smov 8   ;;  %s65_s30 = ssub.s32 %s1603_s18, %s1678_s27 }
   0xd   : > { %p1425_p8 = pnand %p1424_p7, %p82_p1  ;;  %s68_s5 = sadd.s32 1, %s1599_s17 }
   0xe   : > { %p66_p9 = scmp.eq.s32.totalorder %s65_s30, 0  ;;  %p75_p10 = scmp.ne.s32.totalorder %s1599_s17, %s1595_s16 }
   0xf   : > { %1427 = dma.hbm_to_vmem [thread:$0]  (!%p1425_p8), %s154_s23, 6144, %s156_s26, [#allocation4], %s1606_s28, %s1606_s28, %s1607_s29  }
  0x10   : > { %p76_p11 = scmp.eq.s32.totalorder %s1603_s18, 0  ;;  %p1433_p12 = scmp.lt.s32.totalorder %s1603_s18, 5 }
  0x11   : > { %s1691_s6 = scalar_select %p66_p9, %s1599_s17, %s68_s5  }
  0x12   : > { %p77_p13 = por %p76_p11, %p75_p10  ;;  %s169_s7 = sand.u32 1, %s1599_s17  }
  0x13   : > { %s999_s8 = sshll.u32 %s169_s7, 8  ;;  %s1333_s9 = sshll.u32 %s1603_s18, 8 }
  0x14   : > { %s178_s12 = scalar_lea.hbm %s1833_s2, %s1333_s9  ;;  %s173_s13 = scalar_lea.vmem [#allocation6], %s999_s8 }
  0x15   : > { %s181_s14 = sshll.u32 %s173_s13, 4  ;;  %s179_s15 = sshll.u32 %s178_s12, 4  ;;  %s182_s14 = int_to_ptr.vmem [resolvable:$true] %s181_s14  ;;  %s180_s15 = int_to_ptr.hbm [resolvable:$true] %s179_s15 }
  0x16   : > { %p1698_p0 = pnand %p1433_p12, %p77_p13  ;;  %s170_s22 = scalar_lea.sflag [#allocation7], %s169_s7 }
  0x17   : > { %s1503_s23 = sshra.s32 %s180_s15, 4  ;;  %s1510_s30 = scalar_lea.hbm %s1833_s2, 1280  ;;  %s1504_s23 = int_to_ptr.hbm [resolvable:$true] %s1503_s23 }
  0x18   : > { %s1505_s25 = scalar_lea.hbm %s1504_s23, 256  ;;  %p1507_p3 = pneg %p1698_p0 }
  0x19   : > { %p1506_p2 = scmp.ne.s32.totalorder %s1504_s23, %s1505_s25  ;;  %p1511_p9 = scmp.lt.s32.totalorder %s1504_s23, %s1833_s2 }
  0x1a   : > { %p1512_p10 = scmp.lt.s32.totalorder %s1510_s30, %s1505_s25 }
  0x1b   : > { %p1508_p7 = pnand %p1507_p3, %p1506_p2 }
  0x1c   : > { %p1513_p11 = por %p1512_p10, %p1511_p9 }
  0x1d   : > { %p1509_p8 = pneg %p1508_p7 }
  0x1f   : > { %p1514_p12 = pnand %p1513_p11, %p1509_p8 }
  0x21   : > { %1517 = shalt.err (!%p1514_p12)
}
  0x22   : > { %1431 = dma.hbm_to_vmem [thread:$0]  (!%p1698_p0), %s180_s15, 4096, %s182_s14, %s170_s22, %s1606_s28, %s1606_s28, %s1607_s29  }
  0x23   : > { %200 = sbr.rel (%p1669_p6) target bundleno = 459 (0x1cb), region = 36 }
  0x28   : > { %1578 = dma.done.wait (%p82_p1), [#allocation4], 6144  }
  0x29   : > { %1580 = vsyncadd (%p82_p1), [#allocation4], 4294961152  ;;  %s207_s7 = sand.u32 1, %s1595_s16  }
  0x2a   : > { %s1004_s9 = sshll.u32 %s207_s7, 8  ;;  %s208_s10 = scalar_lea.sflag [#allocation7], %s207_s7 }
  0x2b   : > { %s1722_s11 = scalar_lea.vmem [#allocation6], %s1004_s9 }
  0x2c   : > { %1582 = dma.done.wait (%p1662_p5), %s208_s10, 4096  }
  0x2d   : > { %1584 = vsyncadd (%p1662_p5), %s208_s10, 4294963200  ;;  %p236_p6 = scmp.lt.s32.totalorder %s1653_s19, 4 }
  0x2e   : > { %243 = sbr.rel (%p997_p4) target bundleno = 254 (0xfe), region = 48 }
  0x2f   : > { %s237_s24 = scalar_select %p236_p6, %s1653_s19, 4 }
  0x31   : > { %s1005_s28 = sshll.u32 %s237_s24, 1 }
  0x32   : > { %s1733_s13 = scalar_lea.vmem %s1834_s3, %s1005_s28 }
  0x33   : > { %v1065_v0 = vld [vmem:[#allocation3 + $0x70] sm:$0xf]  ;;  %v1349_v1 = vld [vmem:[#allocation3 + $0x74] sm:$0xf0]  ;;  %v1057_v5 = vld [vmem:[#allocation3 + $0x60] sm:$0xf] }
  0x34   : > { %v1129_v2 = vld [vmem:[#allocation3 + $0xf0] sm:$0xf]  ;;  %v1066_v3 = vor.u32 %v1349_v1, %v1065_v0  ;;  %v1365_v4 = vld [vmem:[#allocation3 + $0xf4] sm:$0xf0]  ;;  %v1347_v6 = vld [vmem:[#allocation3 + $0x64] sm:$0xf0] }
  0x35   : > { %v1130_v7 = vor.u32 %v1365_v4, %v1129_v2  ;;  %v1121_v8 = vld [vmem:[#allocation3 + $0xe0] sm:$0xf]  ;;  %v1363_v9 = vld [vmem:[#allocation3 + $0xe4] sm:$0xf0]  ;;  %v1058_v10 = vor.u32 %v1347_v6, %v1057_v5  ;;  %v1049_v11 = vld [vmem:[#allocation3 + $0x50] sm:$0xf] }
  0x36   : > { %545 = vmatpush.bf16.msra.mxu0 %v1066_v3  ;;  %v1122_v12 = vor.u32 %v1363_v9, %v1121_v8  ;;  %v1345_v13 = vld [vmem:[#allocation3 + $0x54] sm:$0xf0]  ;;  %v1193_v14 = vld [vmem:[#allocation3 + $0x170] sm:$0xf]  ;;  %v1185_v19 = vld [vmem:[#allocation3 + $0x160] sm:$0xf] }
  0x37   : > { %558 = vmatpush.bf16.msra.mxu1 %v1130_v7  ;;  %v1381_v15 = vld [vmem:[#allocation3 + $0x174] sm:$0xf0]  ;;  %v1113_v16 = vld [vmem:[#allocation3 + $0xd0] sm:$0xf]  ;;  %v1379_v20 = vld [vmem:[#allocation3 + $0x164] sm:$0xf0]  ;;  %v1050_v22 = vor.u32 %v1345_v13, %v1049_v11 }
  0x38   : > { %v1361_v17 = vld [vmem:[#allocation3 + $0xd4] sm:$0xf0]  ;;  %v1194_v18 = vor.u32 %v1381_v15, %v1193_v14  ;;  %v1348_v21 = vld [vmem:[#allocation3 + $0x74] sm:$0xf]  ;;  %v1041_v23 = vld [vmem:[#allocation3 + $0x40] sm:$0xf]  ;;  %v1186_v25 = vor.u32 %v1379_v20, %v1185_v19 }
  0x39   : > { %v1343_v24 = vld [vmem:[#allocation3 + $0x44] sm:$0xf0]  ;;  %v1067_v26 = vld [vmem:[#allocation3 + $0x78] sm:$0xf0]  ;;  %v1114_v27 = vor.u32 %v1361_v17, %v1113_v16  ;;  %v1105_v28 = vld [vmem:[#allocation3 + $0xc0] sm:$0xf] }
  0x3a   : > { %546 = vmatpush.bf16.msra.mxu0 %v1058_v10  ;;  %571 = vmatpush.bf16.msra.mxu2 %v1194_v18  ;;  %v1359_v29 = vld [vmem:[#allocation3 + $0xc4] sm:$0xf0]  ;;  %v1070_v30 = vor.u32 %v1348_v21, %v1067_v26  ;;  %v1177_v31 = vld [vmem:[#allocation3 + $0x150] sm:$0xf]  ;;  %v1377_v32 = vld [vmem:[#allocation3 + $0x154] sm:$0xf0]  ;;  %v1042_v36 = vor.u32 %v1343_v24, %v1041_v23 }
  0x3b   : > { %559 = vmatpush.bf16.msra.mxu1 %v1122_v12  ;;  %v1346_v33 = vld [vmem:[#allocation3 + $0x64] sm:$0xf]  ;;  %v1059_v34 = vld [vmem:[#allocation3 + $0x68] sm:$0xf0]  ;;  %v1033_v37 = vld [vmem:[#allocation3 + $0x30] sm:$0xf]  ;;  %v1178_v39 = vor.u32 %v1377_v32, %v1177_v31  ;;  %v1106_v41 = vor.u32 %v1359_v29, %v1105_v28 }
  0x3c   : > { %584 = vmatpush.bf16.msra.mxu3 %v1070_v30  ;;  %v1062_v35 = vor.u32 %v1346_v33, %v1059_v34  ;;  %v1341_v38 = vld [vmem:[#allocation3 + $0x34] sm:$0xf0]  ;;  %v1169_v40 = vld [vmem:[#allocation3 + $0x140] sm:$0xf]  ;;  %v1375_v42 = vld [vmem:[#allocation3 + $0x144] sm:$0xf0] }
  0x3d   : > { %v1344_v43 = vld [vmem:[#allocation3 + $0x54] sm:$0xf]  ;;  %v1051_v44 = vld [vmem:[#allocation3 + $0x58] sm:$0xf0]  ;;  %v1097_v45 = vld [vmem:[#allocation3 + $0xb0] sm:$0xf]  ;;  %v1034_v48 = vor.u32 %v1341_v38, %v1033_v37  ;;  %v1170_v50 = vor.u32 %v1375_v42, %v1169_v40 }
  0x3e   : > { %547 = vmatpush.bf16.msra.mxu0 %v1050_v22  ;;  %572 = vmatpush.bf16.msra.mxu2 %v1186_v25  ;;  %v1357_v46 = vld [vmem:[#allocation3 + $0xb4] sm:$0xf0]  ;;  %v1054_v47 = vor.u32 %v1344_v43, %v1051_v44  ;;  %v1025_v49 = vld [vmem:[#allocation3 + $0x20] sm:$0xf]  ;;  %v1342_v51 = vld [vmem:[#allocation3 + $0x44] sm:$0xf] }
  0x3f   : > { %560 = vmatpush.bf16.msra.mxu1 %v1114_v27  ;;  %v1043_v52 = vld [vmem:[#allocation3 + $0x48] sm:$0xf0]  ;;  %v1098_v53 = vor.u32 %v1357_v46, %v1097_v45  ;;  %v1339_v54 = vld [vmem:[#allocation3 + $0x24] sm:$0xf0]  ;;  %v1161_v55 = vld [vmem:[#allocation3 + $0x130] sm:$0xf] }
  0x40   : > { %585 = vmatpush.bf16.msra.mxu3 %v1062_v35  ;;  %v1373_v56 = vld [vmem:[#allocation3 + $0x134] sm:$0xf0]  ;;  %v1089_v57 = vld [vmem:[#allocation3 + $0xa0] sm:$0xf]  ;;  %v1355_v58 = vld [vmem:[#allocation3 + $0xa4] sm:$0xf0]  ;;  %v1046_v59 = vor.u32 %v1342_v51, %v1043_v52  ;;  %v1026_v60 = vor.u32 %v1339_v54, %v1025_v49 }
  0x41   : > { %v1017_v61 = vld [vmem:[#allocation3 + $0x10] sm:$0xf]  ;;  %v1162_v62 = vor.u32 %v1373_v56, %v1161_v55  ;;  %v1340_v63 = vld [vmem:[#allocation3 + $0x34] sm:$0xf]  ;;  %v1035_v0 = vld [vmem:[#allocation3 + $0x38] sm:$0xf0]  ;;  %v1090_v1 = vor.u32 %v1355_v58, %v1089_v57 }
  0x42   : > { %548 = vmatpush.bf16.msra.mxu0 %v1042_v36  ;;  %573 = vmatpush.bf16.msra.mxu2 %v1178_v39  ;;  %v1337_v2 = vld [vmem:[#allocation3 + $0x14] sm:$0xf0]  ;;  %v1153_v3 = vld [vmem:[#allocation3 + $0x120] sm:$0xf]  ;;  %v1371_v4 = vld [vmem:[#allocation3 + $0x124] sm:$0xf0]  ;;  %v1038_v9 = vor.u32 %v1340_v63, %v1035_v0 }
  0x43   : > { %561 = vmatpush.bf16.msra.mxu1 %v1106_v41  ;;  %v1081_v5 = vld [vmem:[#allocation3 + $0x90] sm:$0xf]  ;;  %v1353_v6 = vld [vmem:[#allocation3 + $0x94] sm:$0xf0]  ;;  %v1009_v7 = vld [vmem:[#allocation3] sm:$0xf]  ;;  %v1018_v10 = vor.u32 %v1337_v2, %v1017_v61  ;;  %v1154_v11 = vor.u32 %v1371_v4, %v1153_v3 }
  0x44   : > { %586 = vmatpush.bf16.msra.mxu3 %v1054_v47  ;;  %v1335_v8 = vld [vmem:[#allocation3 + $0x4] sm:$0xf0]  ;;  %v1338_v12 = vld [vmem:[#allocation3 + $0x24] sm:$0xf]  ;;  %v1027_v13 = vld [vmem:[#allocation3 + $0x28] sm:$0xf0]  ;;  %v1082_v15 = vor.u32 %v1353_v6, %v1081_v5 }
  0x45   : > { %v244_v14 = vld [vmem:[%s1831_s0] sm:$0xff]  ;;  %v1073_v16 = vld [vmem:[#allocation3 + $0x80] sm:$0xf]  ;;  %v1145_v17 = vld [vmem:[#allocation3 + $0x110] sm:$0xf]  ;;  %v1030_v24 = vor.u32 %v1338_v12, %v1027_v13  ;;  %v1010_v26 = vor.u32 %v1335_v8, %v1009_v7 }
  0x46   : > { %549 = vmatpush.bf16.msra.mxu0 %v1034_v48  ;;  %574 = vmatpush.bf16.msra.mxu2 %v1170_v50  ;;  %v1369_v18 = vld [vmem:[#allocation3 + $0x114] sm:$0xf0]  ;;  %v1351_v19 = vld [vmem:[#allocation3 + $0x84] sm:$0xf0]  ;;  %v1364_v20 = vld [vmem:[#allocation3 + $0xf4] sm:$0xf]  ;;  %v296_v25 = vunpack.c.l.b16 %v244_v14  ;;  %v297_v28 = vunpack.c.h.b16 %v244_v14 }
  0x47   : > { %562 = vmatpush.bf16.msra.mxu1 %v1098_v53  ;;  %v1131_v21 = vld [vmem:[#allocation3 + $0xf8] sm:$0xf0]  ;;  %v1380_v22 = vld [vmem:[#allocation3 + $0x174] sm:$0xf]  ;;  %v1146_v27 = vor.u32 %v1369_v18, %v1145_v17  ;;  %v245_v31 = vld [vmem:[%s1831_s0 + $0x8] sm:$0xf]  ;;  %v1074_v32 = vor.u32 %v1351_v19, %v1073_v16 }
  0x48   : > { %587 = vmatpush.bf16.msra.mxu3 %v1046_v59  ;;  %v1195_v23 = vld [vmem:[#allocation3 + $0x178] sm:$0xf0]  ;;  %v1336_v29 = vld [vmem:[#allocation3 + $0x14] sm:$0xf]  ;;  %v1134_v33 = vor.u32 %v1364_v20, %v1131_v21  ;;  %v1137_v34 = vld [vmem:[#allocation3 + $0x100] sm:$0xf]  ;;  %v299_v41 = vpack.c.b16 %v296_v25, %v296_v25  ;;  %v298_v43 = vunpack.c.l.b16 %v245_v31  ;;  %v1743_v45 = vpack.c.b16 %v297_v28, %v297_v28 }
  0x49   : > { %v1019_v30 = vld [vmem:[#allocation3 + $0x18] sm:$0xf0]  ;;  %v1367_v35 = vld [vmem:[#allocation3 + $0x104] sm:$0xf0]  ;;  %v1198_v36 = vor.u32 %v1380_v22, %v1195_v23  ;;  %v1362_v37 = vld [vmem:[#allocation3 + $0xe4] sm:$0xf] }
  0x4a   : > { %550 = vmatpush.bf16.msra.mxu0 %v1026_v60  ;;  %575 = vmatpush.bf16.msra.mxu2 %v1162_v62  ;;  %v1123_v38 = vld [vmem:[#allocation3 + $0xe8] sm:$0xf0]  ;;  %v1378_v39 = vld [vmem:[#allocation3 + $0x164] sm:$0xf]  ;;  %v1022_v42 = vor.u32 %v1336_v29, %v1019_v30  ;;  %v1138_v44 = vor.u32 %v1367_v35, %v1137_v34  ;;  %v1360_v50 = vld [vmem:[#allocation3 + $0xd4] sm:$0xf]  ;;  %v301_v54 = vpack.c.b16 %v298_v43, %v298_v43 }
  0x4b   : > { %563 = vmatpush.bf16.msra.mxu1 %v1090_v1  ;;  %v1187_v40 = vld [vmem:[#allocation3 + $0x168] sm:$0xf0]  ;;  %v1334_v46 = vld [vmem:[#allocation3 + $0x4] sm:$0xf]  ;;  %v1126_v48 = vor.u32 %v1362_v37, %v1123_v38  ;;  %v1115_v51 = vld [vmem:[#allocation3 + $0xd8] sm:$0xf0] }
  0x4c   : > { %588 = vmatpush.bf16.msra.mxu3 %v1038_v9  ;;  %v1011_v47 = vld [vmem:[#allocation3 + $0x8] sm:$0xf0]  ;;  %v1190_v49 = vor.u32 %v1378_v39, %v1187_v40  ;;  %v1376_v52 = vld [vmem:[#allocation3 + $0x154] sm:$0xf]  ;;  %v1179_v53 = vld [vmem:[#allocation3 + $0x158] sm:$0xf0]  ;;  %v1118_v56 = vor.u32 %v1360_v50, %v1115_v51 }
  0x4d   : > { %v1014_v55 = vor.u32 %v1334_v46, %v1011_v47  ;;  %v1182_v57 = vor.u32 %v1376_v52, %v1179_v53  ;;  %v1358_v58 = vld [vmem:[#allocation3 + $0xc4] sm:$0xf]  ;;  %v1107_v59 = vld [vmem:[#allocation3 + $0xc8] sm:$0xf0]  ;;  %v1356_v0 = vld [vmem:[#allocation3 + $0xb4] sm:$0xf] }
  0x4e   : > { %551 = vmatpush.bf16.msra.mxu0 %v1018_v10  ;;  %576 = vmatpush.bf16.msra.mxu2 %v1154_v11  ;;  %v1374_v60 = vld [vmem:[#allocation3 + $0x144] sm:$0xf]  ;;  %v1171_v61 = vld [vmem:[#allocation3 + $0x148] sm:$0xf0]  ;;  %v1110_v62 = vor.u32 %v1358_v58, %v1107_v59  ;;  %v1099_v1 = vld [vmem:[#allocation3 + $0xb8] sm:$0xf0] }
  0x4f   : > { %564 = vmatpush.bf16.msra.mxu1 %v1082_v15  ;;  %v1174_v63 = vor.u32 %v1374_v60, %v1171_v61  ;;  %v1372_v2 = vld [vmem:[#allocation3 + $0x134] sm:$0xf]  ;;  %v1163_v3 = vld [vmem:[#allocation3 + $0x138] sm:$0xf0]  ;;  %v1102_v4 = vor.u32 %v1356_v0, %v1099_v1  ;;  %v1354_v6 = vld [vmem:[#allocation3 + $0xa4] sm:$0xf] }
  0x50   : > { %589 = vmatpush.bf16.msra.mxu3 %v1030_v24  ;;  %v1166_v5 = vor.u32 %v1372_v2, %v1163_v3  ;;  %v1091_v7 = vld [vmem:[#allocation3 + $0xa8] sm:$0xf0]  ;;  %v1370_v8 = vld [vmem:[#allocation3 + $0x124] sm:$0xf]  ;;  %v1352_v12 = vld [vmem:[#allocation3 + $0x94] sm:$0xf] }
  0x51   : > { %v1155_v9 = vld [vmem:[#allocation3 + $0x128] sm:$0xf0]  ;;  %v1094_v10 = vor.u32 %v1354_v6, %v1091_v7  ;;  %v1083_v13 = vld [vmem:[#allocation3 + $0x98] sm:$0xf0]  ;;  %v1368_v14 = vld [vmem:[#allocation3 + $0x114] sm:$0xf] }
  0x52   : > { %552 = vmatpush.bf16.msra.mxu0 %v1010_v26  ;;  %577 = vmatpush.bf16.msra.mxu2 %v1146_v27  ;;  %v1158_v11 = vor.u32 %v1370_v8, %v1155_v9  ;;  %v1147_v15 = vld [vmem:[#allocation3 + $0x118] sm:$0xf0]  ;;  %v1086_v16 = vor.u32 %v1352_v12, %v1083_v13  ;;  %v1350_v18 = vld [vmem:[#allocation3 + $0x84] sm:$0xf]  ;;  %v1075_v19 = vld [vmem:[#allocation3 + $0x88] sm:$0xf0] }
  0x53   : > { %565 = vmatpush.bf16.msra.mxu1 %v1074_v32  ;;  %v1150_v17 = vor.u32 %v1368_v14, %v1147_v15  ;;  %v1366_v20 = vld [vmem:[#allocation3 + $0x104] sm:$0xf]  ;;  %v1139_v21 = vld [vmem:[#allocation3 + $0x108] sm:$0xf0]  ;;  %v1078_v22 = vor.u32 %v1350_v18, %v1075_v19 }
  0x54   : > { %590 = vmatpush.bf16.msra.mxu3 %v1022_v42  ;;  %v1142_v23 = vor.u32 %v1366_v20, %v1139_v21 }
  0x55   : > { %553 = vmatmul.bf16.vlgmr.msra.gmra.mxu0 %v299_v41 }
  0x56   : > { %597 = vmatpush.bf16.msrb.mxu0 %v1134_v33  ;;  %578 = vmatpush.bf16.msra.mxu2 %v1138_v44 }
  0x57   : > { %610 = vmatpush.bf16.msrb.mxu1 %v1198_v36 }
  0x58   : > { %566 = vmatmul.bf16.vlgmr.msra.gmra.mxu1 %v1743_v45  ;;  %591 = vmatpush.bf16.msra.mxu3 %v1014_v55 }
  0x59   : > { %579 = vmatmul.bf16.vlgmr.msra.gmra.mxu2 %v301_v54 }
  0x5a   : > { %598 = vmatpush.bf16.msrb.mxu0 %v1126_v48 }
  0x5b   : > { %611 = vmatpush.bf16.msrb.mxu1 %v1190_v49  ;;  %592 = vmatmul.bf16.vlgmr.msra.gmra.mxu3 %v299_v41 }
  0x5e   : > { %599 = vmatpush.bf16.msrb.mxu0 %v1118_v56 }
  0x5f   : > { %612 = vmatpush.bf16.msrb.mxu1 %v1182_v57 }
  0x62   : > { %600 = vmatpush.bf16.msrb.mxu0 %v1110_v62 }
  0x63   : > { %613 = vmatpush.bf16.msrb.mxu1 %v1174_v63 }
  0x66   : > { %601 = vmatpush.bf16.msrb.mxu0 %v1102_v4 }
  0x67   : > { %614 = vmatpush.bf16.msrb.mxu1 %v1166_v5 }
  0x6a   : > { %602 = vmatpush.bf16.msrb.mxu0 %v1094_v10 }
  0x6b   : > { %615 = vmatpush.bf16.msrb.mxu1 %v1158_v11 }
  0x6e   : > { %603 = vmatpush.bf16.msrb.mxu0 %v1086_v16 }
  0x6f   : > { %616 = vmatpush.bf16.msrb.mxu1 %v1150_v17 }
  0x72   : > { %604 = vmatpush.bf16.msrb.mxu0 %v1078_v22 }
  0x73   : > { %617 = vmatpush.bf16.msrb.mxu1 %v1142_v23 }
  0x75   : > { %605 = vmatmul.bf16.vlgmr.msrb.gmra.mxu0 %v1743_v45 }
  0x76   : > { %618 = vmatmul.bf16.vlgmr.msrb.gmra.mxu1 %v301_v54 }
  0xd2   : > { %v554_v24 = vpop.f32.mrf.mxu0 }
  0xd5   : > { %v567_v25 = vpop.f32.mrf.mxu1 }
  0xd6   : > { %v568_v32 = vadd.f32 %v567_v25, %v554_v24 }
  0xda   : > { %v556_v26 = vpop.f32.mrf.mxu0 }
  0xdc   : > { %v580_v28 = vpop.f32.mrf.mxu2 }
  0xdd   : > { %v569_v27 = vpop.f32.mrf.mxu1  ;;  %v581_v33 = vadd.f32 %v580_v28, %v568_v32 }
  0xde   : > { %v593_v29 = vpop.f32.mrf.mxu3 }
  0xdf   : > { %v623_v37 = vmax.f32 %v581_v33, 0.0 }
  0xe1   : > { %v625_v40 = vmin.f32 %v623_v37, 6.0 }
  0xe4   : > { %v582_v30 = vpop.f32.mrf.mxu2 }
  0xe6   : > { %v595_v31 = vpop.f32.mrf.mxu3 }
  0xf2   : > { %v606_v34 = vpop.f32.mrf.mxu0 }
  0xf3   : > { %v607_v35 = vadd.f32 %v606_v34, %v593_v29  ;;  %v619_v36 = vpop.f32.mrf.mxu1 }
  0xf5   : > { %v620_v38 = vadd.f32 %v619_v36, %v607_v35 }
  0xf7   : > { %v624_v39 = vmax.f32 %v620_v38, 0.0 }
  0xf9   : > { %v626_v41 = vmin.f32 %v624_v39, 6.0 }
  0xfa   : > { %v608_v42 = vpop.f32.mrf.mxu0 }
  0xfb   : > { %v627_v43 = vpack.c.bf16 %v626_v41, %v625_v40  ;;  %v621_v44 = vpop.f32.mrf.mxu1 }
  0xfd   : > { %628 = vst [vmem:[#allocation2] sm:$0xff] %v627_v43 }
  0xfe PF: > { %v1257_v45 = vld [vmem:[%s1722_s11 + $0x70] sm:$0xf]  ;;  %v1397_v46 = vld [vmem:[%s1722_s11 + $0x74] sm:$0xf0]  ;;  %v1396_v50 = vld [vmem:[%s1722_s11 + $0x74] sm:$0xf] }
  0xff   : > { %v1321_v47 = vld [vmem:[%s1722_s11 + $0xf0] sm:$0xf]  ;;  %v1258_v48 = vor.u32 %v1397_v46, %v1257_v45  ;;  %v1413_v49 = vld [vmem:[%s1722_s11 + $0xf4] sm:$0xf0]  ;;  %v1259_v51 = vld [vmem:[%s1722_s11 + $0x78] sm:$0xf0] }
 0x100   : > { %v1322_v52 = vor.u32 %v1413_v49, %v1321_v47  ;;  %v1262_v53 = vor.u32 %v1396_v50, %v1259_v51  ;;  %v1412_v54 = vld [vmem:[%s1722_s11 + $0xf4] sm:$0xf]  ;;  %v1323_v55 = vld [vmem:[%s1722_s11 + $0xf8] sm:$0xf0]  ;;  %v1249_v56 = vld [vmem:[%s1722_s11 + $0x60] sm:$0xf] }
 0x101   : > { %829 = vmatpush.bf16.msra.mxu0 %v1258_v48  ;;  %v1326_v57 = vor.u32 %v1412_v54, %v1323_v55  ;;  %v1395_v58 = vld [vmem:[%s1722_s11 + $0x64] sm:$0xf0]  ;;  %v1313_v59 = vld [vmem:[%s1722_s11 + $0xe0] sm:$0xf]  ;;  %v1394_v63 = vld [vmem:[%s1722_s11 + $0x64] sm:$0xf] }
 0x102   : > { %v1411_v60 = vld [vmem:[%s1722_s11 + $0xe4] sm:$0xf0]  ;;  %842 = vmatpush.bf16.msra.mxu1 %v1322_v52  ;;  %855 = vmatpush.bf16.msra.mxu2 %v1262_v53  ;;  %v1250_v61 = vor.u32 %v1395_v58, %v1249_v56  ;;  %v1251_v0 = vld [vmem:[%s1722_s11 + $0x68] sm:$0xf0]  ;;  %v1410_v1 = vld [vmem:[%s1722_s11 + $0xe4] sm:$0xf] }
 0x103   : > { %v1314_v62 = vor.u32 %v1411_v60, %v1313_v59  ;;  %868 = vmatpush.bf16.msra.mxu3 %v1326_v57  ;;  %v1254_v2 = vor.u32 %v1394_v63, %v1251_v0  ;;  %v1315_v3 = vld [vmem:[%s1722_s11 + $0xe8] sm:$0xf0]  ;;  %v1241_v4 = vld [vmem:[%s1722_s11 + $0x50] sm:$0xf]  ;;  %v1393_v5 = vld [vmem:[%s1722_s11 + $0x54] sm:$0xf0] }
 0x104   : > { %v1318_v6 = vor.u32 %v1410_v1, %v1315_v3  ;;  %v1305_v7 = vld [vmem:[%s1722_s11 + $0xd0] sm:$0xf]  ;;  %v1409_v8 = vld [vmem:[%s1722_s11 + $0xd4] sm:$0xf0]  ;;  %v1392_v9 = vld [vmem:[%s1722_s11 + $0x54] sm:$0xf]  ;;  %v1242_v10 = vor.u32 %v1393_v5, %v1241_v4 }
 0x105   : > { %830 = vmatpush.bf16.msra.mxu0 %v1250_v61  ;;  %v1243_v11 = vld [vmem:[%s1722_s11 + $0x58] sm:$0xf0]  ;;  %v1408_v12 = vld [vmem:[%s1722_s11 + $0xd4] sm:$0xf]  ;;  %v1306_v14 = vor.u32 %v1409_v8, %v1305_v7  ;;  %v1233_v16 = vld [vmem:[%s1722_s11 + $0x40] sm:$0xf] }
 0x106   : > { %v1307_v13 = vld [vmem:[%s1722_s11 + $0xd8] sm:$0xf0]  ;;  %843 = vmatpush.bf16.msra.mxu1 %v1314_v62  ;;  %856 = vmatpush.bf16.msra.mxu2 %v1254_v2  ;;  %v1246_v15 = vor.u32 %v1392_v9, %v1243_v11  ;;  %v1391_v17 = vld [vmem:[%s1722_s11 + $0x44] sm:$0xf0]  ;;  %v1297_v18 = vld [vmem:[%s1722_s11 + $0xc0] sm:$0xf] }
 0x107   : > { %869 = vmatpush.bf16.msra.mxu3 %v1318_v6  ;;  %v1310_v19 = vor.u32 %v1408_v12, %v1307_v13  ;;  %v1407_v20 = vld [vmem:[%s1722_s11 + $0xc4] sm:$0xf0]  ;;  %v1390_v21 = vld [vmem:[%s1722_s11 + $0x44] sm:$0xf]  ;;  %v1235_v22 = vld [vmem:[%s1722_s11 + $0x48] sm:$0xf0]  ;;  %v1234_v25 = vor.u32 %v1391_v17, %v1233_v16 }
 0x108   : > { %v1406_v23 = vld [vmem:[%s1722_s11 + $0xc4] sm:$0xf]  ;;  %v1299_v24 = vld [vmem:[%s1722_s11 + $0xc8] sm:$0xf0]  ;;  %v1298_v26 = vor.u32 %v1407_v20, %v1297_v18  ;;  %v1238_v27 = vor.u32 %v1390_v21, %v1235_v22  ;;  %v1225_v28 = vld [vmem:[%s1722_s11 + $0x30] sm:$0xf] }
 0x109   : > { %831 = vmatpush.bf16.msra.mxu0 %v1242_v10  ;;  %v1389_v29 = vld [vmem:[%s1722_s11 + $0x34] sm:$0xf0]  ;;  %v1289_v30 = vld [vmem:[%s1722_s11 + $0xb0] sm:$0xf]  ;;  %v1302_v31 = vor.u32 %v1406_v23, %v1299_v24  ;;  %v1388_v33 = vld [vmem:[%s1722_s11 + $0x34] sm:$0xf] }
 0x10a   : > { %844 = vmatpush.bf16.msra.mxu1 %v1306_v14  ;;  %857 = vmatpush.bf16.msra.mxu2 %v1246_v15  ;;  %v1405_v32 = vld [vmem:[%s1722_s11 + $0xb4] sm:$0xf0]  ;;  %v1227_v34 = vld [vmem:[%s1722_s11 + $0x38] sm:$0xf0]  ;;  %v1404_v35 = vld [vmem:[%s1722_s11 + $0xb4] sm:$0xf]  ;;  %v1226_v37 = vor.u32 %v1389_v29, %v1225_v28 }
 0x10b   : > { %870 = vmatpush.bf16.msra.mxu3 %v1310_v19  ;;  %v1291_v36 = vld [vmem:[%s1722_s11 + $0xb8] sm:$0xf0]  ;;  %v1290_v38 = vor.u32 %v1405_v32, %v1289_v30  ;;  %v1230_v39 = vor.u32 %v1388_v33, %v1227_v34  ;;  %v1217_v40 = vld [vmem:[%s1722_s11 + $0x20] sm:$0xf]  ;;  %v1387_v41 = vld [vmem:[%s1722_s11 + $0x24] sm:$0xf0] }
 0x10c   : > { %v1281_v42 = vld [vmem:[%s1722_s11 + $0xa0] sm:$0xf]  ;;  %v1294_v43 = vor.u32 %v1404_v35, %v1291_v36  ;;  %v1403_v44 = vld [vmem:[%s1722_s11 + $0xa4] sm:$0xf0]  ;;  %v1386_v45 = vld [vmem:[%s1722_s11 + $0x24] sm:$0xf]  ;;  %v1218_v49 = vor.u32 %v1387_v41, %v1217_v40 }
 0x10d   : > { %832 = vmatpush.bf16.msra.mxu0 %v1234_v25  ;;  %v1219_v46 = vld [vmem:[%s1722_s11 + $0x28] sm:$0xf0]  ;;  %v1402_v47 = vld [vmem:[%s1722_s11 + $0xa4] sm:$0xf]  ;;  %v1282_v50 = vor.u32 %v1403_v44, %v1281_v42  ;;  %v1209_v52 = vld [vmem:[%s1722_s11 + $0x10] sm:$0xf] }
 0x10e   : > { %845 = vmatpush.bf16.msra.mxu1 %v1298_v26  ;;  %858 = vmatpush.bf16.msra.mxu2 %v1238_v27  ;;  %v1283_v48 = vld [vmem:[%s1722_s11 + $0xa8] sm:$0xf0]  ;;  %v1222_v51 = vor.u32 %v1386_v45, %v1219_v46  ;;  %v1385_v53 = vld [vmem:[%s1722_s11 + $0x14] sm:$0xf0]  ;;  %v1273_v54 = vld [vmem:[%s1722_s11 + $0x90] sm:$0xf] }
 0x10f   : > { %871 = vmatpush.bf16.msra.mxu3 %v1302_v31  ;;  %v1286_v55 = vor.u32 %v1402_v47, %v1283_v48  ;;  %v1401_v56 = vld [vmem:[%s1722_s11 + $0x94] sm:$0xf0]  ;;  %v1384_v57 = vld [vmem:[%s1722_s11 + $0x14] sm:$0xf]  ;;  %v1211_v58 = vld [vmem:[%s1722_s11 + $0x18] sm:$0xf0]  ;;  %v1210_v61 = vor.u32 %v1385_v53, %v1209_v52 }
 0x110   : > { %v1400_v59 = vld [vmem:[%s1722_s11 + $0x94] sm:$0xf]  ;;  %v1275_v60 = vld [vmem:[%s1722_s11 + $0x98] sm:$0xf0]  ;;  %v1274_v63 = vor.u32 %v1401_v56, %v1273_v54  ;;  %v1214_v0 = vor.u32 %v1384_v57, %v1211_v58  ;;  %v1201_v1 = vld [vmem:[%s1722_s11] sm:$0xf] }
 0x111   : > { %833 = vmatpush.bf16.msra.mxu0 %v1226_v37  ;;  %v629_v62 = vld [vmem:[#allocation2] sm:$0xff]  ;;  %v1383_v2 = vld [vmem:[%s1722_s11 + $0x4] sm:$0xf0]  ;;  %v1265_v3 = vld [vmem:[%s1722_s11 + $0x80] sm:$0xf]  ;;  %v1278_v4 = vor.u32 %v1400_v59, %v1275_v60  ;;  %p1327_p1 = scmp.ge.s32.totalorder %s1653_s19, 4 }
 0x112   : > { %846 = vmatpush.bf16.msra.mxu1 %v1290_v38  ;;  %859 = vmatpush.bf16.msra.mxu2 %v1230_v39  ;;  %v1399_v5 = vld [vmem:[%s1722_s11 + $0x84] sm:$0xf0]  ;;  %v1382_v6 = vld [vmem:[%s1722_s11 + $0x4] sm:$0xf]  ;;  %v1203_v7 = vld [vmem:[%s1722_s11 + $0x8] sm:$0xf0]  ;;  %v663_v10 = vunpack.c.l.b16 %v629_v62  ;;  %v1202_v11 = vor.u32 %v1383_v2, %v1201_v1  ;;  %v664_v12 = vunpack.c.h.b16 %v629_v62 }
 0x113   : > { %872 = vmatpush.bf16.msra.mxu3 %v1294_v43  ;;  %v1398_v8 = vld [vmem:[%s1722_s11 + $0x84] sm:$0xf]  ;;  %v1267_v9 = vld [vmem:[%s1722_s11 + $0x88] sm:$0xf0]  ;;  %v1266_v13 = vor.u32 %v1399_v5, %v1265_v3  ;;  %v1206_v14 = vor.u32 %v1382_v6, %v1203_v7  ;;  %v881_v18 = vld [vmem:[%s1733_s13] sm:$0x3] }
 0x114   : > { %v1270_v15 = vor.u32 %v1398_v8, %v1267_v9  ;;  %v665_v16 = vpack.c.b16 %v663_v10, %v663_v10  ;;  %v666_v17 = vpack.c.b16 %v664_v12, %v664_v12 }
 0x115   : > { %834 = vmatpush.bf16.msra.mxu0 %v1218_v49 }
 0x116   : > { %847 = vmatpush.bf16.msra.mxu1 %v1282_v50  ;;  %860 = vmatpush.bf16.msra.mxu2 %v1222_v51 }
 0x117   : > { %873 = vmatpush.bf16.msra.mxu3 %v1286_v55 }
 0x119   : > { %835 = vmatpush.bf16.msra.mxu0 %v1210_v61 }
 0x11a   : > { %848 = vmatpush.bf16.msra.mxu1 %v1274_v63  ;;  %861 = vmatpush.bf16.msra.mxu2 %v1214_v0 }
 0x11b   : > { %874 = vmatpush.bf16.msra.mxu3 %v1278_v4 }
 0x11d   : > { %836 = vmatpush.bf16.msra.mxu0 %v1202_v11 }
 0x11e   : > { %849 = vmatpush.bf16.msra.mxu1 %v1266_v13  ;;  %862 = vmatpush.bf16.msra.mxu2 %v1206_v14 }
 0x11f   : > { %875 = vmatpush.bf16.msra.mxu3 %v1270_v15 }
 0x120   : > { %837 = vmatmul.bf16.vlgmr.msra.gmra.mxu0 %v665_v16 }
 0x121   : > { %850 = vmatmul.bf16.vlgmr.msra.gmra.mxu1 %v666_v17  ;;  %863 = vmatmul.bf16.vlgmr.msra.gmra.mxu2 %v665_v16 }
 0x122   : > { %876 = vmatmul.bf16.vlgmr.msra.gmra.mxu3 %v666_v17 }
 0x19d   : > { %v838_v19 = vpop.f32.mrf.mxu0 }
 0x19e   : > { %v851_v20 = vpop.f32.mrf.mxu1 }
 0x19f   : > { %v852_v21 = vadd.f32 %v851_v20, %v838_v19 }
 0x1a4   : > { %v864_v22 = vpop.f32.mrf.mxu2 }
 0x1a5   : > { %v877_v23 = vpop.f32.mrf.mxu3  ;;  %v840_v24 = vpop.f32.mrf.mxu0 }
 0x1a6   : > { %v878_v25 = vadd.f32 %v877_v23, %v864_v22  ;;  %v853_v26 = vpop.f32.mrf.mxu1 }
 0x1a9   : > { %885 = sbr.rel (%p1327_p1) target bundleno = 441 (0x1b9), region = 52 }
 0x1ac   : > { %v866_v27 = vpop.f32.mrf.mxu2 }
 0x1ad   : > { %v879_v28 = vpop.f32.mrf.mxu3 }
 0x1ae   : > { %v887_v29 = vperm.slane %v881_v18, 0  ;;  %v888_v30 = vperm.slane %v881_v18, 1 }
 0x1b0   : > { %v891_v31 = vadd.f32 %v887_v29, %v852_v21  ;;  %v892_v32 = vadd.f32 %v888_v30, %v878_v25 }
 0x1b2   : > { %v893_v33 = vmax.f32 %v891_v31, 0.0  ;;  %v894_v34 = vmax.f32 %v892_v32, 0.0 }
 0x1b4   : > { %v895_v35 = vmin.f32 %v893_v33, 6.0  ;;  %v896_v36 = vmin.f32 %v894_v34, 6.0 }
 0x1b6   : > { %v897_v37 = vpack.c.bf16 %v896_v36, %v895_v35 }
 0x1b8   : > { %898 = vst [vmem:[#allocation2] sm:$0xff] %v897_v37 }
 0x1b9 PF: > { %p1328_p4 = scmp.ne.s32.totalorder %s1653_s19, 4 }
 0x1bb   : > { %902 = sbr.rel (%p1328_p4) target bundleno = 454 (0x1c6), region = 56 }
 0x1c0   : > { %v904_v38 = vperm.slane %v881_v18, 0  ;;  %v905_v39 = vperm.slane %v881_v18, 1 }
 0x1c2   : > { %v908_v40 = vadd.f32 %v904_v38, %v852_v21  ;;  %v909_v41 = vadd.f32 %v905_v39, %v878_v25 }
 0x1c4   : > { %910 = vst [vmem:[#allocation8] sm:$0xff] %v908_v40 }
 0x1c5   : > { %911 = vst [vmem:[#allocation8 + $0x8] sm:$0xff] %v909_v41 }
 0x1c6 PF: > { %p1435_p5 = scmp.eq.s32.totalorder %s1653_s19, 4  ;;  %s1608_s22 = smov [#allocation8]  }
 0x1c7   : > { %s918_s23 = sshll.u32 %s1608_s22, 4  ;;  %s920_s26 = sshll.u32 %s1835_s4, 4  ;;  %s919_s23 = int_to_ptr.vmem [resolvable:$true] %s918_s23  ;;  %s921_s26 = int_to_ptr.hbm [resolvable:$true] %s920_s26 }
 0x1c8   : > { %1421 = dma.vmem_to_hbm [thread:$0]  (%p1435_p5), %s919_s23, 256, %s921_s26, [#allocation5]  }
 0x1c9   : > { %1586 = dma.done.wait (%p1435_p5), [#allocation5], 256  }
 0x1ca   : > { %1588 = vsyncadd (%p1435_p5), [#allocation5], 4294967040 }
 0x1cb PF: > { %p16_p13 = scmp.ge.s32.totalorder %s1678_s27, 7   ;;  %s1839_s15 = smov %s1595_s16 }
 0x1cc   : > { %s1840_s16 = smov %s1599_s17  ;;  %s1841_s17 = smov %s1691_s6 }
 0x1cd   : > { %s1842_s18 = smov %s1678_s27  ;;  %18 = sbr.rel (!%p16_p13) target bundleno = 5 (0x5), region = 93 }
 0x1d2   :  { %934 = vsyncpa [#allocation4], 1 }
 0x1d3   :  { %936 = vsyncpa [#allocation4 + $0x1], 1 }
 0x1d4   :  { %937 = vsyncpa [#allocation7], 1 }
 0x1d5   :  { %939 = vsyncpa [#allocation7 + $0x1], 1 }
 0x1d6   :  { %940 = vsyncpa [#allocation5], 1 }
 0x1d7   :  { %942 = vsyncpa [#allocation5 + $0x1], 1 }

</bundles_post_ra>
